<compile_context>
chip_gen: v7x
topology: tpu7x:2x2x1
jax: 0.10.0
libtpu: 0.0.40
codegen_flags: <defaults>
</compile_context>

<pallas_src>
import functools

import jax
import jax.numpy as jnp
from jax.experimental import pallas as pl
from jax.experimental.pallas import tpu as pltpu


def _sse_kernel(x_ref, w_ref, b_ref, o_ref):
    # x_ref / o_ref: (C, TILE_L)  -- channels on sublanes, pixels on lanes
    # w_ref:         (C, 1) f32   -- resident 1x1-conv weight
    # b_ref:         (1,)   f32   -- bias scalar in SMEM
    x = x_ref[...]
    w = w_ref[...]                                   # (C, 1), f32
    b = b_ref[0]

    # 1x1 conv C->1 == channel-axis reduce (VPU multiply + sublane reduce).
    logits = jnp.sum(x.astype(jnp.float32) * w, axis=0, keepdims=True) + b  # (1, TL)
    se = jax.nn.sigmoid(logits)                      # (1, TL), f32

    # Broadcast over channels (sublanes) in the input dtype; lane-dense store.
    o_ref[...] = (x * se.astype(x.dtype)).astype(o_ref.dtype)


def _choose_tile_l(l, c, itemsize, max_bytes=2 << 20, max_lanes=8192):
    """Pick a lane tile: multiple of 128, divides L if possible, <= ~2 MiB."""
    cap = max(128, min(max_lanes, (max_bytes // max(1, c * itemsize)) // 128 * 128))
    best = 0
    t = 128
    while t <= min(l, cap):
        if l % t == 0:
            best = t
        t += 128
    if best:
        return best, l                                # no padding needed
    # Rare fallback (L not a multiple of 128): pad L up and tile the padded axis.
    l_pad = ((l + 127) // 128) * 128
    tile = min(cap, l_pad)
    while l_pad % tile != 0:
        tile -= 128
    return tile, l_pad


@jax.jit
def sse_block(x_nchw, weight, bias):
    """sSE block forward.

    Args:
      x_nchw: (N, C, H, W) input, same axis convention as the PyTorch module.
      weight: (1, C, 1, 1) conv weight (PyTorch Conv2d layout).
      bias:   (1,) conv bias.
    Returns:
      (N, C, H, W) output, x * sigmoid(conv1x1(x)).
    """
    n, c, h, w_dim = x_nchw.shape
    l = h * w_dim
    x3d = x_nchw.reshape(n, c, l)                     # NCHW kept native; HW flattened

    itemsize = jnp.dtype(x3d.dtype).itemsize
    tile_l, l_pad = _choose_tile_l(l, c, itemsize)
    if l_pad != l:
        x3d = jnp.pad(x3d, ((0, 0), (0, 0), (0, l_pad - l)))

    w_col = weight.reshape(c, 1).astype(jnp.float32)  # (C, 1)
    b_arr = bias.reshape(1).astype(jnp.float32)       # (1,)

    grid = (n, l_pad // tile_l)
    out3d = pl.pallas_call(
        _sse_kernel,
        out_shape=jax.ShapeDtypeStruct((n, c, l_pad), x3d.dtype),
        grid_spec=pltpu.PrefetchScalarGridSpec(
            num_scalar_prefetch=0,
            grid=grid,
            in_specs=[
                # x tile: batch dim squeezed, channels full, pixel axis tiled on lanes.
                pl.BlockSpec((None, c, tile_l), lambda i, j: (i, 0, j)),
                pl.BlockSpec((c, 1), lambda i, j: (0, 0)),   # resident conv weight
                pl.BlockSpec(memory_space=pltpu.SMEM),       # bias scalar
            ],
            out_specs=pl.BlockSpec((None, c, tile_l), lambda i, j: (i, 0, j)),
        ),
        compiler_params=pltpu.CompilerParams(
            dimension_semantics=("parallel", "parallel"),
        ),
        cost_estimate=pl.CostEstimate(
            flops=3 * n * c * l_pad,             # reduce (mul+add) + broadcast mul
            transcendentals=n * l_pad,           # sigmoid per pixel
            bytes_accessed=2 * n * c * l_pad * int(itemsize),
        ),
    )(x3d, w_col, b_arr)

    if l_pad != l:
        out3d = out3d[:, :, :l]
    return out3d.reshape(n, c, h, w_dim)


def _reference(x_nchw, weight, bias):
    # Pure-JAX reference of the PyTorch forward (NCHW).
    w_vec = weight.reshape(-1).astype(jnp.float32)             # (C,)
    logits = jnp.einsum("nchw,c->nhw", x_nchw.astype(jnp.float32), w_vec) + bias[0]
    se = jax.nn.sigmoid(logits)[:, None, :, :]                  # (N,1,H,W)
    return (x_nchw.astype(jnp.float32) * se).astype(x_nchw.dtype)


if __name__ == "__main__":
    key = jax.random.PRNGKey(0)
    k_x, k_w, k_b = jax.random.split(key, 3)

    N, C, H, W = 2, 4, 16, 16
    x = jax.random.normal(k_x, (N, C, H, W), dtype=jnp.float32)

    # Deterministic synthetic Conv2d(C, 1, kernel_size=1) parameters.
    # PyTorch shapes: weight (1, C, 1, 1), bias (1,).
    fan_in = C  # C * 1 * 1
    bound = 1.0 / (fan_in ** 0.5)
    conv_w = jax.random.uniform(k_w, (1, C, 1, 1), jnp.float32, -bound, bound)
    conv_b = jax.random.uniform(k_b, (1,), jnp.float32, -bound, bound)

    out = sse_block(x, conv_w, conv_b)
    out = jax.block_until_ready(out)

    ref = _reference(x, conv_w, conv_b)
    assert out.shape == x.shape and out.dtype == x.dtype
    assert jnp.allclose(out, ref, atol=1e-5, rtol=1e-5), "mismatch vs reference"

    print("KERNEL_OK")
</pallas_src>

<mosaic_0001>
module attributes {stable_mosaic.version = 11 : i64} {
  func.func @_sse_kernel(%arg0: i32, %arg1: i32, %arg2: memref<1x4x256xf32, #tpu.memory_space<vmem>>, %arg3: memref<4x1xf32, #tpu.memory_space<vmem>>, %arg4: memref<1xf32, #tpu.memory_space<smem>>, %arg5: memref<1x4x256xf32, #tpu.memory_space<vmem>>) attributes {dimension_semantics = [#tpu.dimension_semantics<parallel>, #tpu.dimension_semantics<parallel>], iteration_bounds = array<i64: 2, 1>, scalar_prefetch = 0 : i64, scratch_operands = 0 : i64, tpu.core_type = #tpu.core_type<tc>, window_params = [{transform_indices = @transform_0, window_bounds = array<i64: 1, 4, 256>}, {pipeline_mode = #tpu.pipeline_mode<synchronous>, transform_indices = @transform_1, window_bounds = array<i64: 4, 1>}, {transform_indices = @transform_2, window_bounds = array<i64: 1>}, {transform_indices = @transform_3, window_bounds = array<i64: 1, 4, 256>}]} {
    %c0 = arith.constant 0 : index
    %c0_0 = arith.constant 0 : index
    %c0_1 = arith.constant 0 : index
    %0 = vector.load %arg2[%c0, %c0_0, %c0_1] : memref<1x4x256xf32, #tpu.memory_space<vmem>>, vector<1x4x256xf32>
    %1 = vector.shape_cast %0 : vector<1x4x256xf32> to vector<4x256xf32>
    %c0_2 = arith.constant 0 : index
    %c0_3 = arith.constant 0 : index
    %2 = vector.load %arg3[%c0_2, %c0_3] : memref<4x1xf32, #tpu.memory_space<vmem>>, vector<4x1xf32>
    %c0_4 = arith.constant 0 : index
    %3 = memref.load %arg4[%c0_4] : memref<1xf32, #tpu.memory_space<smem>>
    %4 = vector.broadcast %2 : vector<4x1xf32> to vector<4x256xf32>
    %5 = arith.mulf %1, %4 : vector<4x256xf32>
    %cst = arith.constant dense<0.000000e+00> : vector<256xf32>
    %6 = vector.multi_reduction <add>, %5, %cst [0] : vector<4x256xf32> to vector<256xf32>
    %7 = vector.shape_cast %6 : vector<256xf32> to vector<1x256xf32>
    %8 = vector.broadcast %3 : f32 to vector<1x256xf32>
    %9 = arith.addf %7, %8 : vector<1x256xf32>
    %10 = arith.negf %9 : vector<1x256xf32>
    %11 = math.exp %10 : vector<1x256xf32>
    %cst_5 = arith.constant 1.000000e+00 : f32
    %12 = vector.broadcast %cst_5 : f32 to vector<1x256xf32>
    %13 = arith.addf %12, %11 : vector<1x256xf32>
    %14 = arith.divf %12, %13 : vector<1x256xf32>
    %15 = vector.broadcast %14 : vector<1x256xf32> to vector<4x256xf32>
    %16 = arith.mulf %1, %15 : vector<4x256xf32>
    %c0_6 = arith.constant 0 : index
    %c0_7 = arith.constant 0 : index
    %c0_8 = arith.constant 0 : index
    %17 = vector.load %arg5[%c0_6, %c0_7, %c0_8] : memref<1x4x256xf32, #tpu.memory_space<vmem>>, vector<1x4x256xf32>
    %18 = vector.shape_cast %17 : vector<1x4x256xf32> to vector<4x256xf32>
    %19 = vector.shape_cast %16 : vector<4x256xf32> to vector<1x4x256xf32>
    tpu.vector_store %arg5[%c0_6, %c0_7, %c0_8], %19 {strides = array<i32>} : memref<1x4x256xf32, #tpu.memory_space<vmem>>, vector<1x4x256xf32>,
    return
  }
  func.func @transform_0(%arg0: i32, %arg1: i32) -> (i32, i32, i32) {
    %c0_i32 = arith.constant 0 : i32
    %c0_i32_0 = arith.constant 0 : i32
    return %arg0, %c0_i32, %arg1 : i32, i32, i32
  }
  func.func @transform_1(%arg0: i32, %arg1: i32) -> (i32, i32) {
    %c0_i32 = arith.constant 0 : i32
    %c0_i32_0 = arith.constant 0 : i32
    %c0_i32_1 = arith.constant 0 : i32
    return %c0_i32, %c0_i32_0 : i32, i32
  }
  func.func @transform_2(%arg0: i32, %arg1: i32) -> i32 {
    %c0_i32 = arith.constant 0 : i32
    %c0_i32_0 = arith.constant 0 : i32
    return %c0_i32 : i32
  }
  func.func @transform_3(%arg0: i32, %arg1: i32) -> (i32, i32, i32) {
    %c0_i32 = arith.constant 0 : i32
    %c0_i32_0 = arith.constant 0 : i32
    return %arg0, %c0_i32, %arg1 : i32, i32, i32
  }
}

</mosaic_0001>

<bundles_post_ra>
// kernel: sse_block.1
= control target key start
LH: loop header
LB: loop body
LE: loop exit
PB: predicated region body
PF: predicated region fallthrough
CT: control target
= control target key end

     0   :  { %s452_s14 = smov 0   ;;  %s454_s15 = smov 0   ;;  %s495_s0 = inlined_call_operand.vmem [shape: f32[2,4,256], index: 0, kind: input, shape index: {}]   ;;  %s496_s1 = inlined_call_operand.vmem [shape: f32[4,1], index: 1, kind: input, shape index: {}]   ;;  %s497_s2 = inlined_call_operand.<no memory space> [shape: f32[1], index: 2, kind: input, shape index: {}]   ;;  %s498_s3 = inlined_call_operand.vmem [shape: f32[2,4,256], index: 3, kind: output, shape index: {}]  }
   0x1   :  { %8 = sst [smem:[#allocation2]] %s497_s2  ;;  %s456_s16 = smov 0  }
   0x2 LB: > { %s26_s2 = sadd.s32 1, %s421_s15  ;;  %p357_p0 = scmp.ge.s32.totalorder %s425_s16, 1  ;;  %s425_s16 = sphi %s456_s16, %s14_s16   ;;  %s421_s15 = sphi %s454_s15, %s500_s15   ;;  %s417_s14 = sphi %s452_s14, %s499_s14  }
   0x3   : > { %p28_p1 = scmp.ge.s32.totalorder %s26_s2, 2  ;;  %p159_p2 = scmp.lt.s32.totalorder %s425_s16, 3 }
   0x5   : > { %s502_s2 = smov (%p28_p1, %s26_s2), 0  ;;  %p160_p3 = pnand %p357_p0, %p159_p2 }
   0x6   : > { %v212_v0 = vld [vmem:[%s496_s1] sm:$0xf] (!%p160_p3)  ;;  %v427_v1 = vmov (!%p160_p3), 0   ;;  %p192_p4 = scmp.lt.s32.totalorder (!%p160_p3), %s417_s14, 1  ;;  %v428_v2 = vmov (!%p160_p3), 839922192   ;;  %v221_v4 = vlaneseq (!%p160_p3) }
   0x7   : > { %163 = sbr.rel (%p160_p3) target bundleno = 188 (0xbc), region = 32  ;;  %394 = vset.pattern.permute.xlu0 (!%p160_p3), %v427_v1  ;;  %v219_v3 = vunpack.c.l.s4 (!%p160_p3), %v428_v2  ;;  %vm230_vm0 = vcmask (!%p160_p3), 1043456   ;;  %s213_s23 = sld [smem:[#allocation2]] (!%p160_p3) }
   0x8   : > { %216 = vperm.xlu0 (!%p160_p3), %394, %v212_v0   ;;  %v222_v6 = vshrl.u32 (!%p160_p3), %v221_v4, 7 }
   0x9   : > { %v220_v5 = vunpack.c.0.s8 (!%p160_p3), %v219_v3 }
   0xb   : > { %v223_v7 = vsub.s32 (!%p160_p3), %v220_v5, %v222_v6 }
   0xd   : > { %v245_v24 = vstv (!%p160_p3), %s213_s23 }
   0xe   : > { %s504_s14 = smov (!%p192_p4, %s417_s14), 1 }
   0xf   : > { %s366_s19 = sshll.u32 %s504_s14, 3 }
  0x10   : > { %s199_s22 = scalar_lea.vmem %s495_s0, %s366_s19  ;;  %s209_s26 = scalar_lea.vmem %s498_s3, %s366_s19 }
  0x11   : > { %v211_v9 = vld [vmem:[%s199_s22] sm:$0xff] }
  0x87   : > { %v217_v8 = vpop.permute.xlu0 %216 }
  0x88   : > { %v224_v10 = vrot.slane %v217_v8, %v223_v7 }
  0x8a   : > { %v226_v11 = vmul.f32 %v224_v10, %v211_v9 }
  0x8c   : > { %v228_v12 = vcombine.high %v226_v11, %v226_v11  ;;  %v231_v13 = vsel %vm230_vm0, %v226_v11, 0.0 }
  0x8d   : > { %v232_v14 = vrot.slane %v231_v13, 4 }
  0x8e   : > { %v238_v15 = vsel %vm230_vm0, %v228_v12, 0.0 }
  0x8f   : > { %v233_v16 = vadd.f32 %v232_v14, %v231_v13  ;;  %v239_v17 = vrot.slane %v238_v15, 4 }
  0x91   : > { %v234_v18 = vrot.slane %v233_v16, 2  ;;  %v240_v19 = vadd.f32 %v239_v17, %v238_v15 }
  0x93   : > { %v235_v20 = vadd.f32 %v234_v18, %v233_v16  ;;  %v241_v21 = vrot.slane %v240_v19, 2 }
  0x95   : > { %v236_v22 = vrot.slane %v235_v20, 1  ;;  %v242_v23 = vadd.f32 %v241_v21, %v240_v19 }
  0x97   : > { %v237_v25 = vadd.f32 %v236_v22, %v235_v20  ;;  %v243_v26 = vrot.slane %v242_v23, 1 }
  0x99   : > { %v244_v27 = vadd.f32 %v243_v26, %v242_v23  ;;  %v246_v28 = vadd.f32 %v245_v24, %v237_v25 }
  0x9b   : > { %v247_v29 = vadd.f32 %v245_v24, %v244_v27  ;;  %v362_v30 = vmul.f32 -1.442695, %v246_v28 }
  0x9d   : > { %395 = vpow2.f32 %v362_v30  ;;  %v363_v31 = vmul.f32 -1.442695, %v247_v29 }
  0x9f   : > { %397 = vpow2.f32 %v363_v31 }
  0xa7   : > { %v396_v32 = vpop.eup %395 }
  0xa8   : > { %v254_v33 = vadd.f32 1.0, %v396_v32 }
  0xa9   : > { %v398_v34 = vpop.eup %397 }
  0xaa   : > { %v255_v35 = vadd.f32 1.0, %v398_v34  ;;  %399 = vrcp.f32 %v254_v33 }
  0xac   : > { %401 = vrcp.f32 %v255_v35 }
  0xb4   : > { %v400_v36 = vpop.eup %399 }
  0xb6   : > { %v402_v37 = vpop.eup %401 }
  0xb7   : > { %v262_v38 = vcombine.low %v400_v36, %v402_v37 }
  0xb9   : > { %v264_v39 = vmul.f32 %v262_v38, %v211_v9 }
  0xbb   : > { %265 = vst [vmem:[%s209_s26] sm:$0xff] %v264_v39 }
  0xbc PF: > { %s14_s16 = sadd.s32 1, %s425_s16   ;;  %s499_s14 = smov %s421_s15 }
  0xbd   : > { %p11_p5 = scmp.ge.s32.totalorder %s14_s16, 4   ;;  %s500_s15 = smov %s502_s2 }
  0xbf   :  { %13 = sbr.rel (!%p11_p5) target bundleno = 2 (0x2), region = 62 }

</bundles_post_ra>
